<compile_context>
chip_gen: v5e
topology: v5e:2x2
jax: 0.10.0
libtpu: 0.0.40
codegen_flags: <defaults>
</compile_context>

<pallas_src>
import functools

import jax
import jax.numpy as jnp
from jax.experimental import pallas as pl
from jax.experimental.pallas import tpu as pltpu


def _pixel_mixer_kernel(x_ref, o_ref, *, margin):
    """x_ref, o_ref: (bg_tile, 5, H, W). Axis 1 is the channel-mod-5 group."""
    m = margin
    H = x_ref.shape[-2]
    W = x_ref.shape[-1]

    # group 4: identity (center tap)
    o_ref[:, 4] = x_ref[:, 4]

    # group 0: out(h, w) = x(h, (w + m) mod W)  -- circular shift left along W
    o_ref[:, 0, :, : W - m] = x_ref[:, 0, :, m:]
    o_ref[:, 0, :, W - m:] = x_ref[:, 0, :, :m]

    # group 1: out(h, w) = x(h, (w - m) mod W)  -- circular shift right along W
    o_ref[:, 1, :, m:] = x_ref[:, 1, :, : W - m]
    o_ref[:, 1, :, :m] = x_ref[:, 1, :, W - m:]

    # group 2: out(h, w) = x((h + m) mod H, w)  -- circular shift up along H
    o_ref[:, 2, : H - m, :] = x_ref[:, 2, m:, :]
    o_ref[:, 2, H - m:, :] = x_ref[:, 2, :m, :]

    # group 3: out(h, w) = x((h - m) mod H, w)  -- circular shift down along H
    o_ref[:, 3, m:, :] = x_ref[:, 3, : H - m, :]
    o_ref[:, 3, :m, :] = x_ref[:, 3, H - m:, :]


def pixel_mixer(x, mix_margin: int = 1):
    """PixelMixer forward. x: (b, planes, H, W) with planes % 5 == 0."""
    b, C, H, W = x.shape
    assert C % 5 == 0, "planes must be divisible by 5"
    m = int(mix_margin)
    assert 1 <= m < min(H, W), "mix_margin must satisfy 1 <= m < min(H, W)"

    G = C // 5
    BG = b * G
    # Free contiguous reshape: channel c of image i maps to row i*G + c//5 with
    # group index c % 5.  No host-side transpose.
    xg = x.reshape(BG, 5, H, W)

    # Rows of xg per grid step: as large as possible while
    #   (a) a block stays under ~2 MiB (double-buffered in+out fits every
    #       generation's scoped VMEM, including v7x's smaller 64 MiB), and
    #   (b) there are >= 2 grid steps when BG allows it, so the "parallel"
    #       axis can split across v7x's two TensorCores.
    itemsize = jnp.dtype(x.dtype).itemsize
    per_row_bytes = 5 * H * W * itemsize
    bg_tile = max(1, min(BG, (2 << 20) // per_row_bytes))
    while BG % bg_tile != 0:          # exact divisor: no ragged last block
        bg_tile -= 1
    if bg_tile == BG and BG % 2 == 0:
        bg_tile = BG // 2             # ensure >= 2 parallel steps
    grid = (BG // bg_tile,)

    kernel = functools.partial(_pixel_mixer_kernel, margin=m)
    out = pl.pallas_call(
        kernel,
        out_shape=jax.ShapeDtypeStruct((BG, 5, H, W), x.dtype),
        grid_spec=pltpu.PrefetchScalarGridSpec(
            num_scalar_prefetch=0,
            grid=grid,
            in_specs=[pl.BlockSpec((bg_tile, 5, H, W),
                                   lambda i: (i, 0, 0, 0))],
            out_specs=pl.BlockSpec((bg_tile, 5, H, W),
                                   lambda i: (i, 0, 0, 0)),
        ),
        compiler_params=pltpu.CompilerParams(
            dimension_semantics=("parallel",)),
    )(xg)
    return out.reshape(b, C, H, W)


class PixelMixerPallas:
    """Drop-in equivalent of the PyTorch PixelMixer (no learnable params)."""

    def __init__(self, planes: int, mix_margin: int = 1):
        assert planes % 5 == 0
        self.planes = planes
        self.mix_margin = mix_margin

    def __call__(self, x):
        assert x.shape[1] == self.planes
        return pixel_mixer(x, self.mix_margin)


# ---------------------------------------------------------------------------
# Pure-JAX reference: faithful translation of the PyTorch forward
# (circular pad + depthwise conv with the fixed 0/1 mask).
# ---------------------------------------------------------------------------
def pixel_mixer_reference(x, mix_margin: int = 1):
    b, planes, H, W = x.shape
    m = mix_margin
    k = 2 * m + 1
    mask = jnp.zeros((planes, 1, k, k), x.dtype)
    mask = mask.at[3::5, 0, 0, m].set(1.0)
    mask = mask.at[2::5, 0, k - 1, m].set(1.0)
    mask = mask.at[1::5, 0, m, 0].set(1.0)
    mask = mask.at[0::5, 0, m, k - 1].set(1.0)
    mask = mask.at[4::5, 0, m, m].set(1.0)
    xp = jnp.pad(x, ((0, 0), (0, 0), (m, m), (m, m)), mode="wrap")
    return jax.lax.conv_general_dilated(
        xp, mask, window_strides=(1, 1), padding="VALID",
        dimension_numbers=("NCHW", "OIHW", "NCHW"),
        feature_group_count=planes)


if __name__ == "__main__":
    key = jax.random.PRNGKey(0)
    b, planes, H, W = 2, 10, 16, 16          # planes % 5 == 0
    mix_margin = 1
    x = jax.random.normal(key, (b, planes, H, W), dtype=jnp.float32)

    mixer = PixelMixerPallas(planes=planes, mix_margin=mix_margin)
    out = jax.block_until_ready(mixer(x))

    ref = jax.block_until_ready(pixel_mixer_reference(x, mix_margin))

    assert out.shape == (b, planes, H, W), out.shape
    err = float(jnp.max(jnp.abs(out - ref)))
    assert jnp.allclose(out, ref, atol=1e-6, rtol=1e-6), err
    print("KERNEL_OK")
</pallas_src>

<mosaic_0001>
module attributes {stable_mosaic.version = 11 : i64} {
  func.func @_pixel_mixer_kernel(%arg0: i32, %arg1: memref<2x5x16x16xf32, #tpu.memory_space<vmem>>, %arg2: memref<2x5x16x16xf32, #tpu.memory_space<vmem>>) attributes {dimension_semantics = [#tpu.dimension_semantics<parallel>], iteration_bounds = array<i64: 2>, scalar_prefetch = 0 : i64, scratch_operands = 0 : i64, tpu.core_type = #tpu.core_type<tc>, window_params = [{transform_indices = @transform_0, window_bounds = array<i64: 2, 5, 16, 16>}, {transform_indices = @transform_1, window_bounds = array<i64: 2, 5, 16, 16>}]} {
    %c0 = arith.constant 0 : index
    %c4 = arith.constant 4 : index
    %c0_0 = arith.constant 0 : index
    %c0_1 = arith.constant 0 : index
    %0 = vector.load %arg1[%c0, %c4, %c0_0, %c0_1] : memref<2x5x16x16xf32, #tpu.memory_space<vmem>>, vector<2x1x16x16xf32>
    %1 = vector.shape_cast %0 : vector<2x1x16x16xf32> to vector<2x16x16xf32>
    %c0_2 = arith.constant 0 : index
    %c4_3 = arith.constant 4 : index
    %c0_4 = arith.constant 0 : index
    %c0_5 = arith.constant 0 : index
    %2 = vector.load %arg2[%c0_2, %c4_3, %c0_4, %c0_5] : memref<2x5x16x16xf32, #tpu.memory_space<vmem>>, vector<2x1x16x16xf32>
    %3 = vector.shape_cast %2 : vector<2x1x16x16xf32> to vector<2x16x16xf32>
    %4 = vector.shape_cast %1 : vector<2x16x16xf32> to vector<2x1x16x16xf32>
    tpu.vector_store %arg2[%c0_2, %c4_3, %c0_4, %c0_5], %4 {strides = array<i32>} : memref<2x5x16x16xf32, #tpu.memory_space<vmem>>, vector<2x1x16x16xf32>,
    %c0_6 = arith.constant 0 : index
    %c0_7 = arith.constant 0 : index
    %c0_8 = arith.constant 0 : index
    %c1 = arith.constant 1 : index
    %5 = vector.load %arg1[%c0_6, %c0_7, %c0_8, %c1] : memref<2x5x16x16xf32, #tpu.memory_space<vmem>>, vector<2x1x16x15xf32>
    %6 = vector.shape_cast %5 : vector<2x1x16x15xf32> to vector<2x16x15xf32>
    %c0_9 = arith.constant 0 : index
    %c0_10 = arith.constant 0 : index
    %c0_11 = arith.constant 0 : index
    %c0_12 = arith.constant 0 : index
    %7 = vector.load %arg2[%c0_9, %c0_10, %c0_11, %c0_12] : memref<2x5x16x16xf32, #tpu.memory_space<vmem>>, vector<2x1x16x15xf32>
    %8 = vector.shape_cast %7 : vector<2x1x16x15xf32> to vector<2x16x15xf32>
    %9 = vector.shape_cast %6 : vector<2x16x15xf32> to vector<2x1x16x15xf32>
    tpu.vector_store %arg2[%c0_9, %c0_10, %c0_11, %c0_12], %9 {strides = array<i32>} : memref<2x5x16x16xf32, #tpu.memory_space<vmem>>, vector<2x1x16x15xf32>,
    %c0_13 = arith.constant 0 : index
    %c0_14 = arith.constant 0 : index
    %c0_15 = arith.constant 0 : index
    %c0_16 = arith.constant 0 : index
    %10 = vector.load %arg1[%c0_13, %c0_14, %c0_15, %c0_16] : memref<2x5x16x16xf32, #tpu.memory_space<vmem>>, vector<2x1x16x1xf32>
    %11 = vector.shape_cast %10 : vector<2x1x16x1xf32> to vector<2x16x1xf32>
    %c0_17 = arith.constant 0 : index
    %c0_18 = arith.constant 0 : index
    %c0_19 = arith.constant 0 : index
    %c15 = arith.constant 15 : index
    %12 = vector.load %arg2[%c0_17, %c0_18, %c0_19, %c15] : memref<2x5x16x16xf32, #tpu.memory_space<vmem>>, vector<2x1x16x1xf32>
    %13 = vector.shape_cast %12 : vector<2x1x16x1xf32> to vector<2x16x1xf32>
    %14 = vector.shape_cast %11 : vector<2x16x1xf32> to vector<2x1x16x1xf32>
    tpu.vector_store %arg2[%c0_17, %c0_18, %c0_19, %c15], %14 {strides = array<i32>} : memref<2x5x16x16xf32, #tpu.memory_space<vmem>>, vector<2x1x16x1xf32>,
    %c0_20 = arith.constant 0 : index
    %c1_21 = arith.constant 1 : index
    %c0_22 = arith.constant 0 : index
    %c0_23 = arith.constant 0 : index
    %15 = vector.load %arg1[%c0_20, %c1_21, %c0_22, %c0_23] : memref<2x5x16x16xf32, #tpu.memory_space<vmem>>, vector<2x1x16x15xf32>
    %16 = vector.shape_cast %15 : vector<2x1x16x15xf32> to vector<2x16x15xf32>
    %c0_24 = arith.constant 0 : index
    %c1_25 = arith.constant 1 : index
    %c0_26 = arith.constant 0 : index
    %c1_27 = arith.constant 1 : index
    %17 = vector.load %arg2[%c0_24, %c1_25, %c0_26, %c1_27] : memref<2x5x16x16xf32, #tpu.memory_space<vmem>>, vector<2x1x16x15xf32>
    %18 = vector.shape_cast %17 : vector<2x1x16x15xf32> to vector<2x16x15xf32>
    %19 = vector.shape_cast %16 : vector<2x16x15xf32> to vector<2x1x16x15xf32>
    tpu.vector_store %arg2[%c0_24, %c1_25, %c0_26, %c1_27], %19 {strides = array<i32>} : memref<2x5x16x16xf32, #tpu.memory_space<vmem>>, vector<2x1x16x15xf32>,
    %c0_28 = arith.constant 0 : index
    %c1_29 = arith.constant 1 : index
    %c0_30 = arith.constant 0 : index
    %c15_31 = arith.constant 15 : index
    %20 = vector.load %arg1[%c0_28, %c1_29, %c0_30, %c15_31] : memref<2x5x16x16xf32, #tpu.memory_space<vmem>>, vector<2x1x16x1xf32>
    %21 = vector.shape_cast %20 : vector<2x1x16x1xf32> to vector<2x16x1xf32>
    %c0_32 = arith.constant 0 : index
    %c1_33 = arith.constant 1 : index
    %c0_34 = arith.constant 0 : index
    %c0_35 = arith.constant 0 : index
    %22 = vector.load %arg2[%c0_32, %c1_33, %c0_34, %c0_35] : memref<2x5x16x16xf32, #tpu.memory_space<vmem>>, vector<2x1x16x1xf32>
    %23 = vector.shape_cast %22 : vector<2x1x16x1xf32> to vector<2x16x1xf32>
    %24 = vector.shape_cast %21 : vector<2x16x1xf32> to vector<2x1x16x1xf32>
    tpu.vector_store %arg2[%c0_32, %c1_33, %c0_34, %c0_35], %24 {strides = array<i32>} : memref<2x5x16x16xf32, #tpu.memory_space<vmem>>, vector<2x1x16x1xf32>,
    %c0_36 = arith.constant 0 : index
    %c2 = arith.constant 2 : index
    %c1_37 = arith.constant 1 : index
    %c0_38 = arith.constant 0 : index
    %25 = vector.load %arg1[%c0_36, %c2, %c1_37, %c0_38] : memref<2x5x16x16xf32, #tpu.memory_space<vmem>>, vector<2x1x15x16xf32>
    %26 = vector.shape_cast %25 : vector<2x1x15x16xf32> to vector<2x15x16xf32>
    %c0_39 = arith.constant 0 : index
    %c2_40 = arith.constant 2 : index
    %c0_41 = arith.constant 0 : index
    %c0_42 = arith.constant 0 : index
    %27 = vector.load %arg2[%c0_39, %c2_40, %c0_41, %c0_42] : memref<2x5x16x16xf32, #tpu.memory_space<vmem>>, vector<2x1x15x16xf32>
    %28 = vector.shape_cast %27 : vector<2x1x15x16xf32> to vector<2x15x16xf32>
    %29 = vector.shape_cast %26 : vector<2x15x16xf32> to vector<2x1x15x16xf32>
    tpu.vector_store %arg2[%c0_39, %c2_40, %c0_41, %c0_42], %29 {strides = array<i32>} : memref<2x5x16x16xf32, #tpu.memory_space<vmem>>, vector<2x1x15x16xf32>,
    %c0_43 = arith.constant 0 : index
    %c2_44 = arith.constant 2 : index
    %c0_45 = arith.constant 0 : index
    %c0_46 = arith.constant 0 : index
    %30 = vector.load %arg1[%c0_43, %c2_44, %c0_45, %c0_46] : memref<2x5x16x16xf32, #tpu.memory_space<vmem>>, vector<2x1x1x16xf32>
    %31 = vector.shape_cast %30 : vector<2x1x1x16xf32> to vector<2x1x16xf32>
    %c0_47 = arith.constant 0 : index
    %c2_48 = arith.constant 2 : index
    %c15_49 = arith.constant 15 : index
    %c0_50 = arith.constant 0 : index
    %32 = vector.load %arg2[%c0_47, %c2_48, %c15_49, %c0_50] : memref<2x5x16x16xf32, #tpu.memory_space<vmem>>, vector<2x1x1x16xf32>
    %33 = vector.shape_cast %32 : vector<2x1x1x16xf32> to vector<2x1x16xf32>
    %34 = vector.shape_cast %31 : vector<2x1x16xf32> to vector<2x1x1x16xf32>
    tpu.vector_store %arg2[%c0_47, %c2_48, %c15_49, %c0_50], %34 {strides = array<i32>} : memref<2x5x16x16xf32, #tpu.memory_space<vmem>>, vector<2x1x1x16xf32>,
    %c0_51 = arith.constant 0 : index
    %c3 = arith.constant 3 : index
    %c0_52 = arith.constant 0 : index
    %c0_53 = arith.constant 0 : index
    %35 = vector.load %arg1[%c0_51, %c3, %c0_52, %c0_53] : memref<2x5x16x16xf32, #tpu.memory_space<vmem>>, vector<2x1x15x16xf32>
    %36 = vector.shape_cast %35 : vector<2x1x15x16xf32> to vector<2x15x16xf32>
    %c0_54 = arith.constant 0 : index
    %c3_55 = arith.constant 3 : index
    %c1_56 = arith.constant 1 : index
    %c0_57 = arith.constant 0 : index
    %37 = vector.load %arg2[%c0_54, %c3_55, %c1_56, %c0_57] : memref<2x5x16x16xf32, #tpu.memory_space<vmem>>, vector<2x1x15x16xf32>
    %38 = vector.shape_cast %37 : vector<2x1x15x16xf32> to vector<2x15x16xf32>
    %39 = vector.shape_cast %36 : vector<2x15x16xf32> to vector<2x1x15x16xf32>
    tpu.vector_store %arg2[%c0_54, %c3_55, %c1_56, %c0_57], %39 {strides = array<i32>} : memref<2x5x16x16xf32, #tpu.memory_space<vmem>>, vector<2x1x15x16xf32>,
    %c0_58 = arith.constant 0 : index
    %c3_59 = arith.constant 3 : index
    %c15_60 = arith.constant 15 : index
    %c0_61 = arith.constant 0 : index
    %40 = vector.load %arg1[%c0_58, %c3_59, %c15_60, %c0_61] : memref<2x5x16x16xf32, #tpu.memory_space<vmem>>, vector<2x1x1x16xf32>
    %41 = vector.shape_cast %40 : vector<2x1x1x16xf32> to vector<2x1x16xf32>
    %c0_62 = arith.constant 0 : index
    %c3_63 = arith.constant 3 : index
    %c0_64 = arith.constant 0 : index
    %c0_65 = arith.constant 0 : index
    %42 = vector.load %arg2[%c0_62, %c3_63, %c0_64, %c0_65] : memref<2x5x16x16xf32, #tpu.memory_space<vmem>>, vector<2x1x1x16xf32>
    %43 = vector.shape_cast %42 : vector<2x1x1x16xf32> to vector<2x1x16xf32>
    %44 = vector.shape_cast %41 : vector<2x1x16xf32> to vector<2x1x1x16xf32>
    tpu.vector_store %arg2[%c0_62, %c3_63, %c0_64, %c0_65], %44 {strides = array<i32>} : memref<2x5x16x16xf32, #tpu.memory_space<vmem>>, vector<2x1x1x16xf32>,
    return
  }
  func.func @transform_0(%arg0: i32) -> (i32, i32, i32, i32) {
    %c0_i32 = arith.constant 0 : i32
    %c0_i32_0 = arith.constant 0 : i32
    %c0_i32_1 = arith.constant 0 : i32
    %c0_i32_2 = arith.constant 0 : i32
    return %arg0, %c0_i32, %c0_i32_0, %c0_i32_1 : i32, i32, i32, i32
  }
  func.func @transform_1(%arg0: i32) -> (i32, i32, i32, i32) {
    %c0_i32 = arith.constant 0 : i32
    %c0_i32_0 = arith.constant 0 : i32
    %c0_i32_1 = arith.constant 0 : i32
    %c0_i32_2 = arith.constant 0 : i32
    return %arg0, %c0_i32, %c0_i32_0, %c0_i32_1 : i32, i32, i32, i32
  }
}

</mosaic_0001>

<bundles_post_ra>
// kernel: tpu_custom_call.1
= control target key start
LH: loop header
LB: loop body
LE: loop exit
PB: predicated region body
PF: predicated region fallthrough
CT: control target
= control target key end

     0   :  { %6 = vsyncpa [#allocation3], 0  ;;  %s817_s0 = inlined_call_operand.hbm [shape: f32[4,5,16,16], index: 0, kind: input, shape index: {}]   ;;  %s818_s1 = inlined_call_operand.hbm [shape: f32[4,5,16,16], index: 1, kind: output, shape index: {}]  }
   0x1   :  { %8 = vsyncpa [#allocation3 + $0x1], 0 }
   0x2   :  { %9 = vsyncpa [#allocation4], 0 }
   0x3   :  { %11 = vsyncpa [#allocation4 + $0x1], 0  ;;  %s607_s6 = smov 0   ;;  %s609_s7 = smov 0  }
   0x4   :  { %s611_s8 = smov 0   ;;  %s613_s9 = smov 0  }
   0x5 LB: > { %s628_s10 = sadd.s32 4294967295, %s587_s9   ;;  %s373_s11 = sadd.s32 4294967294, %s587_s9   ;;  %s587_s9 = sphi %s613_s9, %s826_s9   ;;  %s583_s8 = sphi %s611_s8, %s825_s8   ;;  %s579_s7 = sphi %s609_s7, %s824_s7   ;;  %s575_s6 = sphi %s607_s6, %s823_s6  }
   0x6   : > { %s632_s12 = sadd.s32 1, %s587_s9   ;;  %s24_s13 = sadd.s32 1, %s583_s8 }
   0x7   : > { %s21_s14 = ssub.s32 %s587_s9, %s632_s12  ;;  %p31_p0 = scmp.ne.s32.totalorder %s583_s8, %s579_s7 }
   0x8   : > { %p22_p1 = scmp.eq.s32.totalorder %s21_s14, 0  ;;  %p32_p2 = scmp.eq.s32.totalorder %s587_s9, 0 }
   0x9   : > { %p37_p3 = scmp.ne.s32.totalorder %s579_s7, %s575_s6  ;;  %p38_p4 = scmp.eq.s32.totalorder %s628_s10, 0 }
   0xa   : > { %s644_s15 = scalar_select %p22_p1, %s583_s8, %s24_s13  }
   0xb   : > { %p33_p5 = por %p32_p2, %p31_p0  ;;  %p646_p6 = por %p38_p4, %p37_p3 }
   0xc   : > { %p61_p7 = scmp.eq.s32.totalorder %s628_s10, 1  ;;  %p67_p8 = scmp.eq.s32.totalorder %s373_s11, 1 }
   0xd   : > { %p375_p9 = scmp.ge.s32.totalorder %s587_s9, 2  ;;  %p449_p10 = scmp.lt.s32.totalorder %s587_s9, 2 }
   0xe   : > { %p653_p11 = por %p61_p7, %p31_p0  ;;  %p657_p12 = por %p67_p8, %p37_p3 }
   0xf   : > { %s87_s19 = sand.u32 1, %s583_s8   ;;  %s434_s20 = smul.u32 160, %s587_s9 }
  0x10   : > { %s433_s21 = smul.u32 160, %s87_s19  ;;  %p666_p13 = pnand %p449_p10, %p33_p5 }
  0x11   : > { %s97_s24 = scalar_lea.hbm %s817_s0, %s434_s20  ;;  %s88_s29 = scalar_lea.sflag [#allocation3], %s87_s19 }
  0x12   : > { %s98_s26 = sshll.u32 %s97_s24, 4  ;;  %s91_s27 = scalar_lea.vmem [#allocation2], %s433_s21  ;;  %s99_s26 = int_to_ptr.hbm [resolvable:$true] %s98_s26 }
  0x13   : > { %s100_s28 = sshll.u32 %s91_s27, 4  ;;  %s491_s30 = sshra.s32 %s99_s26, 4  ;;  %s101_s28 = int_to_ptr.vmem [resolvable:$true] %s100_s28  ;;  %s492_s30 = int_to_ptr.hbm [resolvable:$true] %s491_s30 }
  0x14   : > { %s493_s2 = scalar_lea.hbm %s492_s30, 160  ;;  %p495_p1 = pneg %p666_p13 }
  0x15   : > { %p494_p0 = scmp.ne.s32.totalorder %s492_s30, %s493_s2  ;;  %s498_s5 = scalar_lea.hbm %s817_s0, 320 }
  0x16   : > { %p499_p4 = scmp.lt.s32.totalorder %s492_s30, %s817_s0  ;;  %p500_p5 = scmp.lt.s32.totalorder %s498_s5, %s493_s2 }
  0x17   : > { %p496_p2 = pnand %p495_p1, %p494_p0 }
  0x18   : > { %p501_p7 = por %p500_p5, %p499_p4 }
  0x19   : > { %p497_p3 = pneg %p496_p2 }
  0x1b   : > { %p502_p8 = pnand %p501_p7, %p497_p3 }
  0x1d   : > { %505 = shalt.err (!%p502_p8)
}
  0x1e   : > { %s589_s14 = smov 128   ;;  %s590_s19 = smov 8  }
  0x1f   : > { %444 = dma.hbm_to_vmem [thread:$0]  (!%p666_p13), %s99_s26, 2560, %s101_s28, %s88_s29, %s589_s14, %s589_s14, %s590_s19  }
  0x20   : > { %p379_p10 = scmp.ge.s32.totalorder %s587_s9, 1  ;;  %p108_p0 = scmp.lt.s32.totalorder %s587_s9, 3 }
  0x22   : > { %p109_p1 = pnand %p379_p10, %p108_p0 }
  0x23   : > { %s683_s20 = sand.u32 (!%p109_p1), 1, %s579_s7  }
  0x24   : > { %112 = sbr.rel (%p109_p1) target bundleno = 202 (0xca), region = 24  ;;  %s115_s22 = scalar_lea.sflag (!%p109_p1), [#allocation3], %s683_s20 }
  0x25   : > { %s435_s21 = smul.u32 (!%p109_p1), 160, %s683_s20 }
  0x27   : > { %s689_s23 = scalar_lea.vmem (!%p109_p1), [#allocation2], %s435_s21 }
  0x29   : > { %566 = dma.done.wait (%p646_p6), %s115_s22, 2560  }
  0x2a   : > { %568 = vsyncadd (%p646_p6), %s115_s22, 4294964736  ;;  %v151_v0 = vld [vmem:[%s689_s23] sm:$0xff]  ;;  %v153_v1 = vld [vmem:[%s689_s23 + $0x50] sm:$0xff]  ;;  %s591_s24 = smov 127   ;;  %s592_s25 = smov 1   ;;  %vm223_vm0 = vcmask 130056  }
  0x2b   : > { %159 = vrot.lane.b32.xlu0 %v151_v0, %s591_s24  ;;  %163 = vrot.lane.b32.xlu1 %v153_v1, %s591_s24  ;;  %v388_v2 = vld [vmem:[%s689_s23 + $0x10] sm:$0xff]  ;;  %v152_v3 = vld [vmem:[%s689_s23 + $0x8] sm:$0xff]  ;;  %s593_s16 = smov 15   ;;  %s594_s26 = smov 113   ;;  %vm171_vm1 = vcmask 121856   ;;  %vm196_vm2 = vcmask 130168  }
  0x2c   : > { %210 = vrot.lane.b32.xlu2 %v388_v2, %s592_s25  ;;  %v154_v4 = vld [vmem:[%s689_s23 + $0x58] sm:$0xff]  ;;  %v390_v6 = vld [vmem:[%s689_s23 + $0x60] sm:$0xff]  ;;  %v391_v7 = vld [vmem:[%s689_s23 + $0x68] sm:$0xff]  ;;  %s705_s27 = scalar_lea.vmem [#allocation5], %s435_s21  ;;  %vm146_vm3 = vcmask 130048   ;;  %vm260_vm4 = vcmask 129024  }
  0x2d   : > { %v389_v5 = vld [vmem:[%s689_s23 + $0x18] sm:$0xff]  ;;  %v380_v16 = vld [vmem:[%s689_s23 + $0x40] sm:$0xff]  ;;  %v381_v17 = vld [vmem:[%s689_s23 + $0x48] sm:$0xff]  ;;  %vm248_vm5 = vcmask 7168   ;;  %vm266_vm6 = vcmask 122880   ;;  %s436_s28 = smul.u32 160, %s628_s10 }
  0x2e   : > { %v382_v18 = vld [vmem:[%s689_s23 + $0x90] sm:$0xff]  ;;  %v383_v19 = vld [vmem:[%s689_s23 + $0x98] sm:$0xff]  ;;  %384 = vst.msk [vmem:[%s705_s27 + $0x40] sm:$0xff] %vm146_vm3, %v380_v16  ;;  %v404_v20 = vld [vmem:[%s689_s23 + $0x21] sm:$0xff]  ;;  %s297_s10 = sshll.u32 %s705_s27, 4  ;;  %s284_s4 = scalar_lea.sflag [#allocation4], %s683_s20  ;;  %s298_s10 = int_to_ptr.vmem [resolvable:$true] %s297_s10 }
  0x2f   : > { %385 = vst.msk [vmem:[%s705_s27 + $0x48] sm:$0xff] %vm146_vm3, %v381_v17  ;;  %v405_v24 = vld [vmem:[%s689_s23 + $0x29] sm:$0x7f]  ;;  %v406_v25 = vld [vmem:[%s689_s23 + $0x71] sm:$0xff]  ;;  %v407_v26 = vld [vmem:[%s689_s23 + $0x79] sm:$0x7f]  ;;  %s296_s2 = scalar_lea.hbm %s818_s1, %s436_s28 }
  0x30   : > { %386 = vst.msk [vmem:[%s705_s27 + $0x90] sm:$0xff] %vm146_vm3, %v382_v18  ;;  %v412_v27 = vld [vmem:[%s689_s23 + $0x20] sm:$0x1]  ;;  %v413_v28 = vld [vmem:[%s689_s23 + $0x70] sm:$0x1]  ;;  %s299_s3 = sshll.u32 %s296_s2, 4  ;;  %s300_s3 = int_to_ptr.hbm [resolvable:$true] %s299_s3 }
  0x31   : > { %387 = vst.msk [vmem:[%s705_s27 + $0x98] sm:$0xff] %vm146_vm3, %v383_v19  ;;  %v416_v31 = vld [vmem:[%s689_s23 + $0x30] sm:$0xff]  ;;  %v417_v32 = vld [vmem:[%s689_s23 + $0x38] sm:$0x7f]  ;;  %v418_v33 = vld [vmem:[%s689_s23 + $0x80] sm:$0xff]  ;;  %s535_s5 = sshra.s32 %s300_s3, 4  ;;  %s536_s5 = int_to_ptr.hbm [resolvable:$true] %s535_s5 }
  0x32   : > { %408 = vst.msk [vmem:[%s705_s27 + $0x20] sm:$0xff] %vm146_vm3, %v404_v20  ;;  %v419_v34 = vld [vmem:[%s689_s23 + $0x88] sm:$0x7f]  ;;  %v424_v35 = vld [vmem:[%s689_s23 + $0x3f] sm:$0x1]  ;;  %s537_s11 = scalar_lea.hbm %s536_s5, 160  ;;  %p542_p3 = scmp.lt.s32.totalorder %s536_s5, %s818_s1 }
  0x33   : > { %161 = vrot.lane.b32.xlu0 %v152_v3, %s591_s24  ;;  %165 = vrot.lane.b32.xlu1 %v154_v4, %s591_s24  ;;  %409 = vst.msk [vmem:[%s705_s27 + $0x28] sm:$0x7f] %vm260_vm4, %v405_v24  ;;  %v425_v36 = vld [vmem:[%s689_s23 + $0x8f] sm:$0x1]  ;;  %p538_p6 = scmp.ne.s32.totalorder %s536_s5, %s537_s11  ;;  %s541_s19 = scalar_lea.hbm %s818_s1, 320 }
  0x34   : > { %212 = vrot.lane.b32.xlu2 %v389_v5, %s592_s25  ;;  %410 = vst.msk [vmem:[%s705_s27 + $0x70] sm:$0xff] %vm146_vm3, %v406_v25  ;;  %p543_p4 = scmp.lt.s32.totalorder %s541_s19, %s537_s11 }
  0x35   : > { %411 = vst.msk [vmem:[%s705_s27 + $0x78] sm:$0x7f] %vm260_vm4, %v407_v26  ;;  %p539_p13 = pnand %p538_p6, %p653_p11 }
  0x36   : > { %414 = vst.msk [vmem:[%s705_s27 + $0x2f] sm:$0x1] %vm266_vm6, %v412_v27  ;;  %p544_p5 = por %p543_p4, %p542_p3 }
  0x37   : > { %415 = vst.msk [vmem:[%s705_s27 + $0x7f] sm:$0x1] %vm266_vm6, %v413_v28  ;;  %p540_p2 = pneg %p539_p13 }
  0x38   : > { %420 = vst.msk [vmem:[%s705_s27 + $0x31] sm:$0xff] %vm146_vm3, %v416_v31 }
  0x39   : > { %421 = vst.msk [vmem:[%s705_s27 + $0x39] sm:$0x7f] %vm260_vm4, %v417_v32  ;;  %p545_p7 = pnand %p544_p5, %p540_p2 }
  0x3a   : > { %422 = vst.msk [vmem:[%s705_s27 + $0x81] sm:$0xff] %vm146_vm3, %v418_v33 }
  0x3b   : > { %214 = vrot.lane.b32.xlu0 %v390_v6, %s592_s25  ;;  %216 = vrot.lane.b32.xlu1 %v391_v7, %s592_s25  ;;  %423 = vst.msk [vmem:[%s705_s27 + $0x89] sm:$0x7f] %vm260_vm4, %v419_v34 }
  0x3c   : > { %184 = vrot.lane.b32.xlu2 %v151_v0, %s593_s16  ;;  %426 = vst.msk [vmem:[%s705_s27 + $0x30] sm:$0x1] %vm266_vm6, %v424_v35 }
  0x3d   : > { %427 = vst.msk [vmem:[%s705_s27 + $0x80] sm:$0x1] %vm266_vm6, %v425_v36 }
  0x43   : > { %186 = vrot.lane.b32.xlu0 %v152_v3, %s593_s16  ;;  %188 = vrot.lane.b32.xlu1 %v153_v1, %s593_s16 }
  0x44   : > { %190 = vrot.lane.b32.xlu2 %v154_v4, %s593_s16 }
  0x4b   : > { %236 = vrot.lane.b32.xlu0 %v388_v2, %s594_s26  ;;  %238 = vrot.lane.b32.xlu1 %v389_v5, %s594_s26 }
  0x4c   : > { %240 = vrot.lane.b32.xlu2 %v390_v6, %s594_s26 }
  0x53   : > { %242 = vrot.lane.b32.xlu0 %v391_v7, %s594_s26 }
  0x86   : > { %v211_v8 = vpop.permute.xlu2 %210 }
  0x87   : > { %392 = vst.msk [vmem:[%s705_s27 + $0x10] sm:$0xff] %vm223_vm0, %v211_v8 }
  0x8e   : > { %v213_v9 = vpop.permute.xlu2 %212 }
  0x8f   : > { %393 = vst.msk [vmem:[%s705_s27 + $0x18] sm:$0xff] %vm223_vm0, %v213_v9 }
  0x96   : > { %v185_v10 = vpop.permute.xlu2 %184 }
  0x9d   : > { %v160_v11 = vpop.permute.xlu0 %159  ;;  %v164_v12 = vpop.permute.xlu1 %163 }
  0x9e   : > { %172 = vst.msk [vmem:[%s705_s27] sm:$0xff] %vm171_vm1, %v160_v11  ;;  %v191_v13 = vpop.permute.xlu2 %190 }
  0x9f   : > { %174 = vst.msk [vmem:[%s705_s27 + $0x50] sm:$0xff] %vm171_vm1, %v164_v12 }
  0xa0   : > { %197 = vst.msk [vmem:[%s705_s27] sm:$0xff] %vm196_vm2, %v185_v10 }
  0xa5   : > { %v162_v14 = vpop.permute.xlu0 %161  ;;  %v166_v15 = vpop.permute.xlu1 %165 }
  0xa6   : > { %173 = vst.msk [vmem:[%s705_s27 + $0x8] sm:$0xff] %vm171_vm1, %v162_v14  ;;  %v241_v21 = vpop.permute.xlu2 %240 }
  0xa7   : > { %175 = vst.msk [vmem:[%s705_s27 + $0x58] sm:$0xff] %vm171_vm1, %v166_v15 }
  0xa8   : > { %200 = vst.msk [vmem:[%s705_s27 + $0x58] sm:$0xff] %vm196_vm2, %v191_v13 }
  0xad   : > { %v215_v22 = vpop.permute.xlu0 %214  ;;  %v217_v23 = vpop.permute.xlu1 %216 }
  0xae   : > { %394 = vst.msk [vmem:[%s705_s27 + $0x60] sm:$0xff] %vm223_vm0, %v215_v22 }
  0xaf   : > { %395 = vst.msk [vmem:[%s705_s27 + $0x68] sm:$0xff] %vm223_vm0, %v217_v23 }
  0xb0   : > { %402 = vst.msk [vmem:[%s705_s27 + $0x60] sm:$0xff] %vm248_vm5, %v241_v21 }
  0xb5   : > { %v187_v29 = vpop.permute.xlu0 %186  ;;  %v189_v30 = vpop.permute.xlu1 %188 }
  0xb6   : > { %198 = vst.msk [vmem:[%s705_s27 + $0x8] sm:$0xff] %vm196_vm2, %v187_v29 }
  0xb7   : > { %199 = vst.msk [vmem:[%s705_s27 + $0x50] sm:$0xff] %vm196_vm2, %v189_v30 }
  0xbd   : > { %v237_v37 = vpop.permute.xlu0 %236  ;;  %v239_v38 = vpop.permute.xlu1 %238 }
  0xbe   : > { %400 = vst.msk [vmem:[%s705_s27 + $0x10] sm:$0xff] %vm248_vm5, %v237_v37 }
  0xbf   : > { %401 = vst.msk [vmem:[%s705_s27 + $0x18] sm:$0xff] %vm248_vm5, %v239_v38 }
  0xc5   : > { %v243_v39 = vpop.permute.xlu0 %242 }
  0xc6   : > { %403 = vst.msk [vmem:[%s705_s27 + $0x68] sm:$0xff] %vm248_vm5, %v243_v39 }
  0xc7   : > { %548 = shalt.err (!%p545_p7)
}
  0xc8   : > { %s595_s20 = smov 128   ;;  %s596_s23 = smov 8  }
  0xc9   : > { %439 = dma.vmem_to_hbm [thread:$0]  (%p653_p11), %s298_s10, 2560, %s300_s3, %s284_s4, %s595_s20, %s595_s20, %s596_s23  }
  0xca PF: > { %s314_s24 = sand.u32 1, %s575_s6   ;;  %p446_p8 = pnand %p375_p9, %p657_p12 }
  0xcb   : > { %s315_s25 = scalar_lea.sflag [#allocation4], %s314_s24 }
  0xcc   : > { %p447_p10 = pneg %p446_p8 }
  0xce   : > { %570 = dma.done.wait (%p447_p10), %s315_s25, 2560  }
  0xcf   : > { %572 = vsyncadd (%p447_p10), %s315_s25, 4294964736  ;;  %p14_p0 = scmp.ge.s32.totalorder %s632_s12, 4   ;;  %s823_s6 = smov %s579_s7 }
  0xd0   : > { %s824_s7 = smov %s583_s8  ;;  %s825_s8 = smov %s644_s15 }
  0xd1   : > { %s826_s9 = smov %s632_s12  ;;  %16 = sbr.rel (!%p14_p0) target bundleno = 5 (0x5), region = 77 }
  0xd6   :  { %321 = vsyncpa [#allocation3], 1 }
  0xd7   :  { %323 = vsyncpa [#allocation3 + $0x1], 1 }
  0xd8   :  { %324 = vsyncpa [#allocation4], 1 }
  0xd9   :  { %326 = vsyncpa [#allocation4 + $0x1], 1 }

</bundles_post_ra>
